<compile_context>
chip_gen: v7x
topology: tpu7x:2x2x1
jax: 0.10.0
libtpu: 0.0.40
codegen_flags: <defaults>
</compile_context>

<pallas_src>
import jax
import jax.numpy as jnp
from jax import lax
from jax.experimental import pallas as pl
from jax.experimental.pallas import tpu as pltpu


def _round_up(n, m):
    return (n + m - 1) // m * m


def _dense_nn_kernel(x_ref, w1t_ref, b1_ref, w2t_ref, b2_ref, o_ref):
    # x_ref:   (TB, D)  batch tile (rows = batch samples)
    # w1t_ref: (H, D)   fc1 weight, transposed (resident in VMEM)
    # b1_ref:  (H, 1)   fc1 bias as a column (broadcasts over lanes)
    # w2t_ref: (1, H)   fc2 weight, transposed (resident in VMEM)
    # b2_ref:  (1,)     fc2 bias, scalar in SMEM
    # o_ref:   (1, TB)  lane-dense output (batch on lanes)
    x = x_ref[...]
    # NT matmul: contract D of (H, D) with D of (TB, D) -> (H, TB).
    # Batch lands on the lane axis; no in-kernel transpose of the big tile needed.
    h = lax.dot_general(
        w1t_ref[...], x,
        dimension_numbers=(((1,), (1,)), ((), ())),
        preferred_element_type=jnp.float32,
    )
    h = jnp.maximum(h + b1_ref[...], 0.0)  # bias + ReLU, f32 on the VPU
    y = jnp.dot(w2t_ref[...], h, preferred_element_type=jnp.float32)  # (1, TB)
    o_ref[...] = (y + b2_ref[0]).astype(o_ref.dtype)


def dense_nn_forward(x, w1, b1, w2, b2, *, x_dtype=jnp.float32, tb_max=4096):
    """Fused Flatten -> fc1 -> ReLU -> fc2.

    x:  (B, T, F)
    w1: (T*F, H), b1: (H,)   (weights stored transposed vs torch.nn.Linear: (in, out))
    w2: (H, 1),   b2: (1,)
    returns: (B, 1) float32
    """
    B, T, F = x.shape
    D = T * F
    H = w1.shape[1]

    # Glue: flatten exactly like torch .view + Flatten (row-major), optional bf16.
    x2d = x.reshape(B, D).astype(x_dtype)

    # Batch tile: big (amortizes per-step overhead), multiple of 128 so the
    # lane-dense output tile is unmasked.  Single tile when B is small.
    if B <= tb_max:
        TB = _round_up(max(B, 1), 128)
    else:
        TB = tb_max
    B_pad = _round_up(B, TB)
    if B_pad != B:
        # Zero-pad the tail tile; padded rows are sliced off after the kernel.
        x2d = jnp.pad(x2d, ((0, B_pad - B), (0, 0)))
    num_tiles = B_pad // TB

    # Parameters in the transposed layout the kernel expects.
    w1t = w1.T.astype(x_dtype)            # (H, D) — same dtype as x for the MXU
    w2t = w2.T.astype(jnp.float32)        # (1, H)
    b1c = b1.reshape(H, 1).astype(jnp.float32)
    b2s = b2.reshape(1).astype(jnp.float32)

    x_bytes = jnp.dtype(x_dtype).itemsize
    # VMEM budget: double-buffered x tile + double-buffered output tile + slack
    # for resident weights/biases.  Stays well under every generation's scoped cap.
    x_tile_vmem = _round_up(TB, 16) * _round_up(D, 128) * x_bytes
    out_tile_vmem = 8 * _round_up(TB, 128) * 4
    vmem_limit = int(max(2 * x_tile_vmem + 2 * out_tile_vmem + (4 << 20), 16 << 20))

    cost = pl.CostEstimate(
        flops=2 * B_pad * D * H + 2 * B_pad * H,
        transcendentals=0,
        bytes_accessed=B_pad * D * x_bytes + B_pad * 4 + (H * D + H + H + 1) * 4,
    )

    out = pl.pallas_call(
        _dense_nn_kernel,
        out_shape=jax.ShapeDtypeStruct((1, B_pad), jnp.float32),
        grid=(num_tiles,),
        in_specs=[
            pl.BlockSpec((TB, D), lambda i: (i, 0)),            # x: tiled over batch
            pl.BlockSpec((H, D), lambda i: (0, 0)),             # w1^T: resident
            pl.BlockSpec((H, 1), lambda i: (0, 0)),             # b1 column: resident
            pl.BlockSpec((1, H), lambda i: (0, 0)),             # w2^T: resident
            pl.BlockSpec(memory_space=pltpu.MemorySpace.SMEM),  # b2 scalar
        ],
        out_specs=pl.BlockSpec((1, TB), lambda i: (0, i)),      # lane-dense output
        compiler_params=pltpu.CompilerParams(
            dimension_semantics=("parallel",),
            vmem_limit_bytes=vmem_limit,
        ),
        cost_estimate=cost,
    )(x2d, w1t, b1c, w2t, b2s)

    # (1, B_pad) lane-dense result -> (B, 1) like the PyTorch module.
    return out[0, :B].reshape(B, 1)


def init_params(key, feature_size, lookback, step, hidden=32):
    """Deterministic init matching the torch module's parameter shapes
    (weights stored transposed: (in, out))."""
    T = lookback // step
    D = T * feature_size
    k1, k2, k3, k4 = jax.random.split(key, 4)
    lim1 = 1.0 / jnp.sqrt(D)
    lim2 = 1.0 / jnp.sqrt(hidden)
    w1 = jax.random.uniform(k1, (D, hidden), jnp.float32, -lim1, lim1)
    b1 = jax.random.uniform(k2, (hidden,), jnp.float32, -lim1, lim1)
    w2 = jax.random.uniform(k3, (hidden, 1), jnp.float32, -lim2, lim2)
    b2 = jax.random.uniform(k4, (1,), jnp.float32, -lim2, lim2)
    return w1, b1, w2, b2


def reference_forward(x, w1, b1, w2, b2):
    B, T, F = x.shape
    x2d = x.reshape(B, T * F)
    h = jnp.maximum(x2d @ w1 + b1[None, :], 0.0)
    return h @ w2 + b2[None, :]


if __name__ == "__main__":
    # Shapes consistent with the module: feature_size=4, lookback=48, step=6
    # -> T = 8, in_features = 32, hidden = 32, out = 1
    feature_size, lookback, step = 4, 48, 6
    batch = 2
    T = lookback // step

    key = jax.random.PRNGKey(0)
    kx, kp, kx2 = jax.random.split(key, 3)
    x = jax.random.normal(kx, (batch, T, feature_size), jnp.float32)
    w1, b1, w2, b2 = init_params(kp, feature_size, lookback, step)

    # f32 path (exact vs reference).
    y = dense_nn_forward(x, w1, b1, w2, b2)
    y = jax.block_until_ready(y)
    y_ref = reference_forward(x, w1, b1, w2, b2)
    assert y.shape == (batch, 1), y.shape
    assert jnp.allclose(y, y_ref, atol=1e-5, rtol=1e-5), (y, y_ref)

    # bf16-input path (halves HBM traffic for x); looser tolerance.
    y_bf = dense_nn_forward(x, w1, b1, w2, b2, x_dtype=jnp.bfloat16)
    y_bf = jax.block_until_ready(y_bf)
    assert jnp.allclose(y_bf, y_ref, atol=5e-2, rtol=5e-2), (y_bf, y_ref)

    # Multi-tile path (non-divisible batch, small tb_max to force grid > 1).
    B2 = 300
    x2 = jax.random.normal(kx2, (B2, T, feature_size), jnp.float32)
    y2 = dense_nn_forward(x2, w1, b1, w2, b2, tb_max=128)
    y2 = jax.block_until_ready(y2)
    y2_ref = reference_forward(x2, w1, b1, w2, b2)
    assert y2.shape == (B2, 1), y2.shape
    assert jnp.allclose(y2, y2_ref, atol=1e-5, rtol=1e-5)

    print("KERNEL_OK")
</pallas_src>

<mosaic_0001>
module attributes {stable_mosaic.version = 11 : i64} {
  func.func @_dense_nn_kernel(%arg0: i32, %arg1: memref<128x32xf32, #tpu.memory_space<vmem>>, %arg2: memref<32x32xf32, #tpu.memory_space<vmem>>, %arg3: memref<32x1xf32, #tpu.memory_space<vmem>>, %arg4: memref<1x32xf32, #tpu.memory_space<vmem>>, %arg5: memref<1xf32, #tpu.memory_space<smem>>, %arg6: memref<1x128xf32, #tpu.memory_space<vmem>>) attributes {dimension_semantics = [#tpu.dimension_semantics<parallel>], iteration_bounds = array<i64: 1>, scalar_prefetch = 0 : i64, scratch_operands = 0 : i64, tpu.core_type = #tpu.core_type<tc>, window_params = [{transform_indices = @transform_0, window_bounds = array<i64: 128, 32>}, {pipeline_mode = #tpu.pipeline_mode<synchronous>, transform_indices = @transform_1, window_bounds = array<i64: 32, 32>}, {pipeline_mode = #tpu.pipeline_mode<synchronous>, transform_indices = @transform_2, window_bounds = array<i64: 32, 1>}, {pipeline_mode = #tpu.pipeline_mode<synchronous>, transform_indices = @transform_3, window_bounds = array<i64: 1, 32>}, {transform_indices = @transform_4, window_bounds = array<i64: 1>}, {transform_indices = @transform_5, window_bounds = array<i64: 1, 128>}]} {
    %c0 = arith.constant 0 : index
    %c0_0 = arith.constant 0 : index
    %0 = vector.load %arg1[%c0, %c0_0] : memref<128x32xf32, #tpu.memory_space<vmem>>, vector<128x32xf32>
    %c0_1 = arith.constant 0 : index
    %c0_2 = arith.constant 0 : index
    %1 = vector.load %arg2[%c0_1, %c0_2] : memref<32x32xf32, #tpu.memory_space<vmem>>, vector<32x32xf32>
    %cst = arith.constant dense<0.000000e+00> : vector<32x128xf32>
    %2 = tpu.matmul %1, %0, %cst {dimension_numbers = #tpu.dot_dimension_numbers<[1], [1], [0], [0], [0, 0, 1, 0], [], []>} : vector<32x32xf32>, vector<128x32xf32>, vector<32x128xf32> -> vector<32x128xf32>
    %c0_3 = arith.constant 0 : index
    %c0_4 = arith.constant 0 : index
    %3 = vector.load %arg3[%c0_3, %c0_4] : memref<32x1xf32, #tpu.memory_space<vmem>>, vector<32x1xf32>
    %4 = vector.broadcast %3 : vector<32x1xf32> to vector<32x128xf32>
    %5 = arith.addf %2, %4 : vector<32x128xf32>
    %cst_5 = arith.constant 0.000000e+00 : f32
    %6 = vector.broadcast %cst_5 : f32 to vector<32x128xf32>
    %7 = arith.maximumf %5, %6 : vector<32x128xf32>
    %c0_6 = arith.constant 0 : index
    %c0_7 = arith.constant 0 : index
    %8 = vector.load %arg4[%c0_6, %c0_7] : memref<1x32xf32, #tpu.memory_space<vmem>>, vector<1x32xf32>
    %cst_8 = arith.constant dense<0.000000e+00> : vector<1x128xf32>
    %9 = tpu.matmul %8, %7, %cst_8 {dimension_numbers = #tpu.dot_dimension_numbers<[1], [0], [0], [1], [0, 0, 1, 1], [], []>} : vector<1x32xf32>, vector<32x128xf32>, vector<1x128xf32> -> vector<1x128xf32>
    %c0_9 = arith.constant 0 : index
    %10 = memref.load %arg5[%c0_9] : memref<1xf32, #tpu.memory_space<smem>>
    %11 = vector.broadcast %10 : f32 to vector<1x128xf32>
    %12 = arith.addf %9, %11 : vector<1x128xf32>
    %c0_10 = arith.constant 0 : index
    %c0_11 = arith.constant 0 : index
    %13 = vector.load %arg6[%c0_10, %c0_11] : memref<1x128xf32, #tpu.memory_space<vmem>>, vector<1x128xf32>
    tpu.vector_store %arg6[%c0_10, %c0_11], %12 {strides = array<i32>} : memref<1x128xf32, #tpu.memory_space<vmem>>, vector<1x128xf32>,
    return
  }
  func.func @transform_0(%arg0: i32) -> (i32, i32) {
    %c0_i32 = arith.constant 0 : i32
    %c0_i32_0 = arith.constant 0 : i32
    return %arg0, %c0_i32 : i32, i32
  }
  func.func @transform_1(%arg0: i32) -> (i32, i32) {
    %c0_i32 = arith.constant 0 : i32
    %c0_i32_0 = arith.constant 0 : i32
    %c0_i32_1 = arith.constant 0 : i32
    return %c0_i32, %c0_i32_0 : i32, i32
  }
  func.func @transform_2(%arg0: i32) -> (i32, i32) {
    %c0_i32 = arith.constant 0 : i32
    %c0_i32_0 = arith.constant 0 : i32
    %c0_i32_1 = arith.constant 0 : i32
    return %c0_i32, %c0_i32_0 : i32, i32
  }
  func.func @transform_3(%arg0: i32) -> (i32, i32) {
    %c0_i32 = arith.constant 0 : i32
    %c0_i32_0 = arith.constant 0 : i32
    %c0_i32_1 = arith.constant 0 : i32
    return %c0_i32, %c0_i32_0 : i32, i32
  }
  func.func @transform_4(%arg0: i32) -> i32 {
    %c0_i32 = arith.constant 0 : i32
    %c0_i32_0 = arith.constant 0 : i32
    return %c0_i32 : i32
  }
  func.func @transform_5(%arg0: i32) -> (i32, i32) {
    %c0_i32 = arith.constant 0 : i32
    %c0_i32_0 = arith.constant 0 : i32
    return %c0_i32, %arg0 : i32, i32
  }
}

</mosaic_0001>

<bundles_post_ra>
// kernel: tpu_custom_call.1
= control target key start
LH: loop header
LB: loop body
LE: loop exit
PB: predicated region body
PF: predicated region fallthrough
CT: control target
= control target key end

     0   :  { %vm66_vm0 = vcmask 261120   ;;  %v487_v6 = vmov 0   ;;  %s655_s0 = inlined_call_operand.vmem [shape: f32[128,32], index: 0, kind: input, shape index: {}]   ;;  %s656_s1 = inlined_call_operand.vmem [shape: f32[32,32], index: 1, kind: input, shape index: {}]   ;;  %s657_s2 = inlined_call_operand.vmem [shape: f32[32,1], index: 2, kind: input, shape index: {}]   ;;  %s658_s3 = inlined_call_operand.vmem [shape: f32[1,32], index: 3, kind: input, shape index: {}]   ;;  %s659_s4 = inlined_call_operand.<no memory space> [shape: f32[1], index: 4, kind: input, shape index: {}]   ;;  %s660_s5 = inlined_call_operand.hbm [shape: f32[1,128], index: 5, kind: output, shape index: {}]  }
   0x1   :  { %v22_v0 = vld [vmem:[%s655_s0] sm:$0xff]  ;;  %v23_v1 = vld [vmem:[%s655_s0 + $0x8] sm:$0xff]  ;;  %v24_v2 = vld [vmem:[%s655_s0 + $0x10] sm:$0xff]  ;;  %461 = vset.pattern.permute.xlu0 %v487_v6  ;;  %462 = vset.pattern.permute.xlu1 %v487_v6 }
   0x2   :  { %v402_v3 = vpack.c.bf16 %v23_v1, %v22_v0  ;;  %vm533_vm1 = vmpackc.low %vm66_vm0, %vm66_vm0  ;;  %v25_v5 = vld [vmem:[%s655_s0 + $0x18] sm:$0xff]  ;;  %v38_v8 = vld [vmem:[%s656_s1] sm:$0xff] }
   0x3   :  { %v408_v7 = vpack.c.bf16 %v25_v5, %v24_v2  ;;  %v26_v9 = vld [vmem:[%s655_s0 + $0x20] sm:$0xff]  ;;  %v27_v10 = vld [vmem:[%s655_s0 + $0x28] sm:$0xff]  ;;  %385 = vmatprep.mubr.msk.f32.mxu0 %vm66_vm0, %v38_v8  ;;  %v44_v12 = vld [vmem:[%s657_s2 + $0x10] sm:$0xff] }
   0x4   :  { %404 = vmatprep.subr.msk.bf16.mxu0 %vm533_vm1, %v402_v3  ;;  %v42_v11 = vld [vmem:[%s657_s2] sm:$0xff]  ;;  %58 = vperm.xlu1 %462, %v44_v12  }
   0x5   :  { %407 = vmatpush3.bf16.xpose.msk.msra.mxu0 %vm533_vm1, %v402_v3  ;;  %48 = vperm.xlu0 %461, %v42_v11  }
   0x6   :  { %410 = vmatprep.subr.msk.bf16.mxu0 %vm533_vm1, %v408_v7 }
   0x7   :  { %11 = vsyncpa [#allocation4], 0  ;;  %v414_v13 = vpack.c.bf16 %v27_v10, %v26_v9  ;;  %v43_v14 = vld [vmem:[%s657_s2 + $0x8] sm:$0xff]  ;;  %v45_v15 = vld [vmem:[%s657_s2 + $0x18] sm:$0xff]  ;;  %v488_v34 = vmov 0.0|0.0   ;;  %vm489_vm2 = vmmov 0   ;;  %v218_v55 = vstv %s659_s4 }
   0x8   :  { %63 = vperm.xlu1 %462, %v45_v15   ;;  %v28_v16 = vld [vmem:[%s655_s0 + $0x30] sm:$0xff]  ;;  %v29_v17 = vld [vmem:[%s655_s0 + $0x38] sm:$0xff]  ;;  %v30_v19 = vld [vmem:[%s655_s0 + $0x40] sm:$0xff]  ;;  %450 = vmatprep.subr.bf16.mxu1 %v488_v34  ;;  %v490_v35 = vmov 0.0   ;;  %s491_s17 = smov [#allocation3]  }
   0x9   :  { %53 = vperm.xlu0 %461, %v43_v14   ;;  %v420_v18 = vpack.c.bf16 %v29_v17, %v28_v16  ;;  %v31_v20 = vld [vmem:[%s655_s0 + $0x48] sm:$0xff]  ;;  %v32_v22 = vld [vmem:[%s655_s0 + $0x50] sm:$0xff]  ;;  %v33_v23 = vld [vmem:[%s655_s0 + $0x58] sm:$0xff]  ;;  %399 = vmatprep.mubr.msk.f32.mxu1 %vm489_vm2, %v490_v35  ;;  %s299_s18 = sshll.u32 %s491_s17, 4  ;;  %s300_s18 = int_to_ptr.vmem [resolvable:$true] %s299_s18 }
   0xa   :  { %v426_v21 = vpack.c.bf16 %v31_v20, %v30_v19  ;;  %v432_v24 = vpack.c.bf16 %v33_v23, %v32_v22  ;;  %v34_v25 = vld [vmem:[%s655_s0 + $0x60] sm:$0xff]  ;;  %v35_v26 = vld [vmem:[%s655_s0 + $0x68] sm:$0xff]  ;;  %v36_v28 = vld [vmem:[%s655_s0 + $0x70] sm:$0xff]  ;;  %s463_s2 = scalar_lea.vmem %s300_s18, 16  ;;  %s467_s19 = scalar_lea.vmem %s300_s18, 32 }
   0xb   :  { %v438_v27 = vpack.c.bf16 %v35_v26, %v34_v25  ;;  %v37_v29 = vld [vmem:[%s655_s0 + $0x78] sm:$0xff]  ;;  %v39_v31 = vld [vmem:[%s656_s1 + $0x8] sm:$0xff]  ;;  %v40_v32 = vld [vmem:[%s656_s1 + $0x10] sm:$0xff]  ;;  %p464_p0 = scmp.ne.s32.totalorder %s300_s18, %s463_s2  ;;  %p468_p1 = scmp.lt.s32.totalorder %s300_s18, %s300_s18 }
   0xc   :  { %v444_v30 = vpack.c.bf16 %v37_v29, %v36_v28  ;;  %v41_v33 = vld [vmem:[%s656_s1 + $0x18] sm:$0xff]  ;;  %v216_v54 = vld [vmem:[%s658_s3] sm:$0x1]  ;;  %p469_p2 = scmp.lt.s32.totalorder %s467_s19, %s463_s2 }
   0xd   :  { %413 = vmatpush3.bf16.xpose.msk.msra.mxu0 %vm533_vm1, %v408_v7 }
   0xe   :  { %416 = vmatprep.subr.msk.bf16.mxu0 %vm533_vm1, %v414_v13  ;;  %p470_p3 = por %p469_p2, %p468_p1 }
  0x10   :  { %p471_p4 = pnand %p470_p3, %p464_p0 }
  0x15   :  { %419 = vmatpush3.bf16.xpose.msk.msra.mxu0 %vm533_vm1, %v414_v13 }
  0x16   :  { %422 = vmatprep.subr.msk.bf16.mxu0 %vm533_vm1, %v420_v18 }
  0x1d   :  { %425 = vmatpush3.bf16.xpose.msk.msra.mxu0 %vm533_vm1, %v420_v18 }
  0x1e   :  { %428 = vmatprep.subr.msk.bf16.mxu0 %vm533_vm1, %v426_v21 }
  0x25   :  { %431 = vmatpush3.bf16.xpose.msk.msra.mxu0 %vm533_vm1, %v426_v21 }
  0x26   :  { %434 = vmatprep.subr.msk.bf16.mxu0 %vm533_vm1, %v432_v24 }
  0x2d   :  { %437 = vmatpush3.bf16.xpose.msk.msra.mxu0 %vm533_vm1, %v432_v24 }
  0x2e   :  { %440 = vmatprep.subr.msk.bf16.mxu0 %vm533_vm1, %v438_v27 }
  0x35   :  { %443 = vmatpush3.bf16.xpose.msk.msra.mxu0 %vm533_vm1, %v438_v27 }
  0x36   :  { %446 = vmatprep.subr.msk.bf16.mxu0 %vm533_vm1, %v444_v30 }
  0x3d   :  { %449 = vmatpush3.bf16.xpose.msk.msra.mxu0 %vm533_vm1, %v444_v30 }
  0x44   :  { %386 = vmatmul.mubr.msk.f32.vlgmr.msra.gmra.mrb[0].mxu0 %vm66_vm0, %v39_v31 }
  0x45   :  { %388 = vmatprep.mubr.msk.f32.mxu0 %vm66_vm0, %v40_v32 }
  0x48   :  { %389 = vmatmul.mubr.msk.f32.gmra.mrb[2].mxu0 %vm66_vm0, %v41_v33 }
  0x83   :  { %v59_v37 = vpop.permute.xlu1 %58 }
  0x84   :  { %v49_v36 = vpop.permute.xlu0 %48 }
  0x87   :  { %v64_v44 = vpop.permute.xlu1 %63 }
  0x88   :  { %v54_v38 = vpop.permute.xlu0 %53 }
 0x117   :  { %v387_v39 = vpop.f32.mrb[0].mxu0 }
 0x118   :  { %v199_v40 = vadd.f32 %v387_v39, %v54_v38  ;;  %v193_v41 = vpop.f32.mrb[1].mxu0 }
 0x119   :  { %v194_v42 = vadd.f32 %v193_v41, %v49_v36 }
 0x11a   :  { %v213_v43 = vmax.f32 %v199_v40, 0.0 }
 0x11b   :  { %v212_v45 = vmax.f32 %v194_v42, 0.0  ;;  %v390_v46 = vpop.f32.mrb[2].mxu0 }
 0x11c   :  { %v209_v47 = vadd.f32 %v390_v46, %v64_v44  ;;  %v203_v48 = vpop.f32.mrb[3].mxu0 }
 0x11d   :  { %v204_v49 = vadd.f32 %v203_v48, %v59_v37  ;;  %v451_v50 = vpack.c.bf16 %v213_v43, %v212_v45 }
 0x11e   :  { %v215_v51 = vmax.f32 %v209_v47, 0.0 }
 0x11f   :  { %v214_v52 = vmax.f32 %v204_v49, 0.0  ;;  %452 = vmatpush3.bf16.msra.mxu1 %v451_v50 }
 0x120   :  { %453 = vmatprep.subr.bf16.mxu1 %v488_v34 }
 0x121   :  { %v454_v53 = vpack.c.bf16 %v215_v51, %v214_v52 }
 0x123   :  { %455 = vmatpush3.bf16.msra.mxu1 %v454_v53 }
 0x126   :  { %400 = vmatmul.mubr.msk.f32.vlgmr.msra.gmra.mrb[0].mxu1 %vm66_vm0, %v216_v54 }
 0x1f9   :  { %v288_v56 = vpop.f32.mrb[0].mxu1 }
 0x1fa   :  { %v289_v57 = vadd.f32 %v288_v56, %v218_v55  ;;  %v401_v58 = vpop.f32.mrb[1].mxu1 }
 0x1fc   :  { %292 = vst [vmem:[#allocation3] sm:$0x1] %v289_v57 }
 0x1fd   :  { %474 = shalt.err (!%p471_p4)
}
 0x1fe   :  { %s475_s21 = scalar_lea.hbm %s660_s5, 16 }
 0x1ff   :  { %p476_p5 = scmp.ne.s32.totalorder %s660_s5, %s475_s21  ;;  %p479_p6 = scmp.lt.u32.totalorder %s475_s21, %s660_s5 }
 0x201   :  { %p481_p7 = pnand %p479_p6, %p476_p5 }
 0x203   :  { %484 = shalt.err (!%p481_p7)
}
 0x204   :  { %302 = dma.vmem_to_hbm [thread:$0]  %s300_s18, 16, %s660_s5, [#allocation4]  }
 0x205   :  { %485 = dma.done.wait [#allocation4], 16  }
 0x206   :  { %486 = vsyncadd [#allocation4], 4294967280 }
 0x207   :  { %306 = vsyncpa [#allocation4], 1 }

</bundles_post_ra>
